<compile_context>
chip_gen: v6e
topology: v6e:2x2x1
jax: 0.10.0
libtpu: 0.0.40
codegen_flags: <defaults>
</compile_context>

<pallas_src>
import functools

import jax
import jax.numpy as jnp
from jax import lax
from jax.experimental import pallas as pl
from jax.experimental.pallas import tpu as pltpu

IGNORE_INDEX = -100       # CrossEntropyLoss default ignore_index
NEG_INF = -1e30           # bias for padded label columns (kills them in max/logsumexp)

# Older-jax fallbacks (cheap safety; no-ops on current versions).
_CompilerParams = getattr(pltpu, "CompilerParams", None) or getattr(pltpu, "TPUCompilerParams")


def _round_up(n, m):
    return ((n + m - 1) // m) * m


def _vmem_limit_bytes():
    """Generation-aware scoped-VMEM cap (v7x: ~48 MiB, v5e/v6e: ~96 MiB)."""
    phys = 64 << 20  # conservative default = v7x (smallest VMEM)
    try:
        phys = int(pltpu.get_tpu_info().vmem_capacity_bytes)
    except Exception:
        pass
    return int(min(phys * 3 // 4, 100 << 20))


def _pick_tile_rows(n_rows, hp, lp, in_isz, vmem_budget, tm_max=1024):
    """Largest row tile (multiple of 8, <= tm_max) fitting the VMEM budget."""
    resident = hp * lp * in_isz + lp * 4 + (2 << 20)        # single-buffered W^T + bias + slack
    per_row = 2 * hp * in_isz + 2 * lp * in_isz + 2 * 4     # x + logits (double-buffered) + labels
    usable = max(vmem_budget - resident, per_row * 8)
    tm = min(tm_max, usable // per_row)
    tm = max(8, (int(tm) // 8) * 8)
    tm = min(tm, _round_up(n_rows, 8))                      # never bigger than the data
    # Keep >= 2 grid steps when there is enough work (v7x: 2 TensorCores share the grid).
    if n_rows > 8 and pl.cdiv(n_rows, tm) < 2:
        tm = max(8, _round_up(pl.cdiv(n_rows, 2), 8))
    return int(tm)


def _resident_spec(shape):
    """Constant-index BlockSpec, single-buffered when the API supports it."""
    idx = lambda i: (0,) * len(shape)
    try:
        return pl.BlockSpec(shape, idx, pipeline_mode=pl.Buffered(1))
    except (AttributeError, TypeError):
        return pl.BlockSpec(shape, idx)


def _slot_tag_kernel(x_ref, wt_ref, b_ref, lab_ref, logits_ref, part_ref, *, n_rows, tm):
    """Per row-tile: logits = x @ W^T + b ; emit packed masked-CE partial (sum, count)."""
    i = pl.program_id(0)

    x = x_ref[...]                                            # (tm, Hp), input dtype
    logits = jnp.dot(x, wt_ref[...],
                     preferred_element_type=jnp.float32)      # (tm, Lp) f32 on the MXU
    logits = logits + b_ref[...]                              # broadcast (1, Lp) f32
    logits_ref[...] = logits.astype(logits_ref.dtype)         # lane-dense (Lp=128) store

    labels = lab_ref[...]                                     # (tm, 1) int32, mask folded in
    # Ragged tail tile: rows past n_rows carry garbage (OOB read) -> force-ignore them.
    row = i * tm + lax.broadcasted_iota(jnp.int32, (tm, 1), 0)
    valid = (labels != IGNORE_INDEX) & (row < n_rows)         # (tm, 1)

    # log-softmax cross-entropy per token (f32).  Padded label columns carry a
    # -1e30 bias, so they contribute exp(-inf)=0 to the sum and never win the max.
    m = jnp.max(logits, axis=-1, keepdims=True)               # (tm, 1)
    lse = jnp.log(jnp.sum(jnp.exp(logits - m), axis=-1, keepdims=True)) + m
    iota = lax.broadcasted_iota(jnp.int32, logits.shape, 1)   # (tm, Lp)
    onehot = (iota == labels).astype(jnp.float32)             # no match for -100 labels
    picked = jnp.sum(logits * onehot, axis=-1, keepdims=True) # (tm, 1)

    per_tok = jnp.where(valid, lse - picked, 0.0)             # garbage rows -> 0
    tile_sum = jnp.sum(per_tok)
    tile_cnt = jnp.sum(valid.astype(jnp.float32))

    # One packed (1, 1, 128) partial slab per tile: lane 0 = loss sum, lane 1 = count.
    lane = lax.broadcasted_iota(jnp.int32, part_ref.shape, 2)
    part_ref[...] = jnp.where(lane == 0, tile_sum,
                              jnp.where(lane == 1, tile_cnt, 0.0)).astype(part_ref.dtype)


@functools.partial(jax.jit, static_argnames=("trim_logits",))
def slot_tagging_forward(sequence_output, attention_mask, labels, W, b, *, trim_logits=True):
    """Pallas implementation of SlotTaggingModel.forward's (loss, logits).

    sequence_output: (B, S, H) f32 or bf16  -- base-model output (dropout identity in eval)
    attention_mask : (B, S)    int
    labels         : (B, S)    int
    W              : (L, H)    same dtype family as sequence_output (PyTorch layout)
    b              : (L,)      f32
    returns (loss_scalar f32, logits (B, S, L) — or (B, S, Lp) if trim_logits=False)
    """
    B, S, H = sequence_output.shape
    L = W.shape[0]
    N = B * S
    in_dtype = sequence_output.dtype
    in_isz = jnp.dtype(in_dtype).itemsize

    Hp = _round_up(H, 128)                # lane-aligned contraction dim (pad only if needed)
    Lp = _round_up(L, 128)                # lane-dense label dim (keep at 128, not 256)

    # ---- host-side layout prep (no row pad of x) --------------------------------
    x = sequence_output.reshape(N, H)
    if Hp != H:
        x = jnp.pad(x, ((0, 0), (0, Hp - H)))                 # feature pad only when ragged

    # Fold attention_mask into labels (active_labels) on the host: one int stream.
    act_lab = jnp.where(attention_mask.reshape(N) == 1,
                        labels.reshape(N).astype(jnp.int32),
                        jnp.int32(IGNORE_INDEX)).reshape(N, 1)

    wt = W.T.astype(in_dtype)                                 # (H, L)
    if Hp != H or Lp != L:
        wt = jnp.pad(wt, ((0, Hp - H), (0, Lp - L)))          # (Hp, Lp)
    b2 = jnp.full((1, Lp), NEG_INF, jnp.float32).at[0, :L].set(b.astype(jnp.float32))

    # ---- generation-aware tiling -------------------------------------------------
    vmem_limit = _vmem_limit_bytes()
    tm = _pick_tile_rows(N, Hp, Lp, in_isz, vmem_limit - (4 << 20))
    G = pl.cdiv(N, tm)

    kernel = functools.partial(_slot_tag_kernel, n_rows=N, tm=tm)

    logits_flat, part = pl.pallas_call(
        kernel,
        out_shape=(
            jax.ShapeDtypeStruct((N, Lp), in_dtype),          # lane-dense logits, no row pad
            jax.ShapeDtypeStruct((G, 1, 128), jnp.float32),   # packed (sum, count) per tile
        ),
        grid_spec=pltpu.PrefetchScalarGridSpec(
            num_scalar_prefetch=0,
            grid=(G,),
            in_specs=[
                pl.BlockSpec((tm, Hp), lambda i: (i, 0)),     # x tile (double-buffered)
                _resident_spec((Hp, Lp)),                     # W^T, resident, single-buffered
                _resident_spec((1, Lp)),                      # bias, resident
                pl.BlockSpec((tm, 1), lambda i: (i, 0)),      # active labels
            ],
            out_specs=[
                pl.BlockSpec((tm, Lp), lambda i: (i, 0)),     # logits tile
                pl.BlockSpec((1, 1, 128), lambda i: (i, 0, 0)),
            ],
        ),
        compiler_params=_CompilerParams(
            dimension_semantics=("parallel",),                # row tiles independent (v7x 2-TC)
            vmem_limit_bytes=vmem_limit,
        ),
    )(x, wt, b2, act_lab)

    # Finish the masked-mean reduction outside the kernel.
    # NOTE: if every token is masked, count==0 and loss is NaN (matches PyTorch).
    loss = jnp.sum(part[:, 0, 0]) / jnp.sum(part[:, 0, 1])

    if trim_logits and Lp != L:
        logits = logits_flat[:, :L].reshape(B, S, L)          # extra HBM pass; opt out if unneeded
    else:
        logits = logits_flat.reshape(B, S, logits_flat.shape[-1])
    return loss, logits


def _reference(sequence_output, attention_mask, labels, W, b):
    """Pure-JAX (f32) reference mirroring the PyTorch forward."""
    x = sequence_output.astype(jnp.float32)
    logits = jnp.einsum("bsh,lh->bsl", x, W.astype(jnp.float32)) + b.astype(jnp.float32)
    L = logits.shape[-1]
    act_lab = jnp.where(attention_mask.reshape(-1) == 1,
                        labels.reshape(-1), IGNORE_INDEX)
    lg = logits.reshape(-1, L)
    lse = jax.nn.logsumexp(lg, axis=-1)
    picked = jnp.take_along_axis(
        lg, jnp.clip(act_lab, 0, L - 1)[:, None], axis=-1)[:, 0]
    valid = act_lab != IGNORE_INDEX
    loss = jnp.where(valid, lse - picked, 0.0).sum() / valid.sum()
    return loss, logits


if __name__ == "__main__":
    key = jax.random.PRNGKey(0)
    B, S, H, L, V = 2, 8, 32, 8, 50   # batch, seq, hidden, num_labels, vocab

    k_emb, k_ids, k_lab, k_w = jax.random.split(key, 4)

    # Synthetic "base_model": deterministic embedding lookup producing sequence_output.
    emb_table = jax.random.normal(k_emb, (V, H), dtype=jnp.float32)
    input_ids = jax.random.randint(k_ids, (B, S), 0, V, dtype=jnp.int32)
    sequence_output = emb_table[input_ids]                      # (B, S, H)

    # attention mask: batch 0 fully active, batch 1 last 3 tokens padded.
    attention_mask = jnp.ones((B, S), dtype=jnp.int32).at[1, S - 3:].set(0)
    labels = jax.random.randint(k_lab, (B, S), 0, L, dtype=jnp.int32)

    # TaggerHead params: weight ~ N(0, 0.02), bias = 0 (as in __init__).
    W = 0.02 * jax.random.normal(k_w, (L, H), dtype=jnp.float32)
    b = jnp.zeros((L,), dtype=jnp.float32)

    ref_loss, ref_logits = _reference(sequence_output, attention_mask, labels, W, b)

    # f32 path — numerically equivalent to the reference.
    loss, logits = slot_tagging_forward(sequence_output, attention_mask, labels, W, b)
    loss, logits = jax.block_until_ready((loss, logits))
    assert logits.shape == (B, S, L)
    assert jnp.allclose(logits, ref_logits, atol=1e-5, rtol=1e-5)
    assert jnp.allclose(loss, ref_loss, atol=1e-5, rtol=1e-5)

    # bf16 input path — halves HBM traffic; MXU accumulates f32, loss math is f32.
    loss16, logits16 = slot_tagging_forward(
        sequence_output.astype(jnp.bfloat16), attention_mask, labels,
        W.astype(jnp.bfloat16), b)
    loss16, logits16 = jax.block_until_ready((loss16, logits16))
    assert jnp.allclose(logits16.astype(jnp.float32), ref_logits, atol=5e-2, rtol=5e-2)
    assert jnp.allclose(loss16, ref_loss, atol=5e-2, rtol=5e-2)

    print("KERNEL_OK")
</pallas_src>

<mosaic_0001>
module attributes {stable_mosaic.version = 11 : i64} {
  func.func @_slot_tag_kernel(%arg0: i32, %arg1: memref<8x128xf32, #tpu.memory_space<vmem>>, %arg2: memref<128x128xf32, #tpu.memory_space<vmem>>, %arg3: memref<1x128xf32, #tpu.memory_space<vmem>>, %arg4: memref<8x1xi32, #tpu.memory_space<vmem>>, %arg5: memref<8x128xf32, #tpu.memory_space<vmem>>, %arg6: memref<1x1x128xf32, #tpu.memory_space<vmem>>) attributes {dimension_semantics = [#tpu.dimension_semantics<parallel>], iteration_bounds = array<i64: 2>, scalar_prefetch = 0 : i64, scratch_operands = 0 : i64, tpu.core_type = #tpu.core_type<tc>, window_params = [{transform_indices = @transform_0, window_bounds = array<i64: 8, 128>}, {pipeline_mode = #tpu.pipeline_mode<synchronous>, transform_indices = @transform_1, window_bounds = array<i64: 128, 128>}, {pipeline_mode = #tpu.pipeline_mode<synchronous>, transform_indices = @transform_2, window_bounds = array<i64: 1, 128>}, {transform_indices = @transform_3, window_bounds = array<i64: 8, 1>}, {transform_indices = @transform_4, window_bounds = array<i64: 8, 128>}, {transform_indices = @transform_5, window_bounds = array<i64: 1, 1, 128>}]} {
    %c0 = arith.constant 0 : index
    %c0_0 = arith.constant 0 : index
    %0 = vector.load %arg1[%c0, %c0_0] : memref<8x128xf32, #tpu.memory_space<vmem>>, vector<8x128xf32>
    %c0_1 = arith.constant 0 : index
    %c0_2 = arith.constant 0 : index
    %1 = vector.load %arg2[%c0_1, %c0_2] : memref<128x128xf32, #tpu.memory_space<vmem>>, vector<128x128xf32>
    %cst = arith.constant dense<0.000000e+00> : vector<8x128xf32>
    %2 = tpu.matmul %0, %1, %cst {dimension_numbers = #tpu.dot_dimension_numbers<[1], [0], [0], [1], [0, 0, 1, 1], [], []>} : vector<8x128xf32>, vector<128x128xf32>, vector<8x128xf32> -> vector<8x128xf32>
    %c0_3 = arith.constant 0 : index
    %c0_4 = arith.constant 0 : index
    %3 = vector.load %arg3[%c0_3, %c0_4] : memref<1x128xf32, #tpu.memory_space<vmem>>, vector<1x128xf32>
    %4 = vector.broadcast %3 : vector<1x128xf32> to vector<8x128xf32>
    %5 = arith.addf %2, %4 : vector<8x128xf32>
    %c0_5 = arith.constant 0 : index
    %c0_6 = arith.constant 0 : index
    %6 = vector.load %arg5[%c0_5, %c0_6] : memref<8x128xf32, #tpu.memory_space<vmem>>, vector<8x128xf32>
    tpu.vector_store %arg5[%c0_5, %c0_6], %5 {strides = array<i32>} : memref<8x128xf32, #tpu.memory_space<vmem>>, vector<8x128xf32>,
    %c0_7 = arith.constant 0 : index
    %c0_8 = arith.constant 0 : index
    %7 = vector.load %arg4[%c0_7, %c0_8] : memref<8x1xi32, #tpu.memory_space<vmem>>, vector<8x1xi32>
    %c8_i32 = arith.constant 8 : i32
    %8 = arith.muli %arg0, %c8_i32 : i32
    %9 = tpu.iota {dimensions = array<i32: 0>} : vector<8x1xi32>
    %10 = vector.broadcast %8 : i32 to vector<8x1xi32>
    %11 = arith.addi %10, %9 : vector<8x1xi32>
    %c-100_i32 = arith.constant -100 : i32
    %12 = vector.broadcast %c-100_i32 : i32 to vector<8x1xi32>
    %13 = arith.cmpi ne, %7, %12 : vector<8x1xi32>
    %c16_i32 = arith.constant 16 : i32
    %14 = vector.broadcast %c16_i32 : i32 to vector<8x1xi32>
    %15 = arith.cmpi slt, %11, %14 : vector<8x1xi32>
    %16 = arith.andi %13, %15 : vector<8x1xi1>
    %cst_9 = arith.constant dense<0xFF800000> : vector<8xf32>
    %17 = vector.multi_reduction <maximumf>, %5, %cst_9 [1] : vector<8x128xf32> to vector<8xf32>
    %18 = vector.shape_cast %17 : vector<8xf32> to vector<8x1xf32>
    %19 = vector.broadcast %18 : vector<8x1xf32> to vector<8x128xf32>
    %20 = arith.subf %5, %19 : vector<8x128xf32>
    %21 = math.exp %20 : vector<8x128xf32>
    %cst_10 = arith.constant dense<0.000000e+00> : vector<8xf32>
    %22 = vector.multi_reduction <add>, %21, %cst_10 [1] : vector<8x128xf32> to vector<8xf32>
    %23 = vector.shape_cast %22 : vector<8xf32> to vector<8x1xf32>
    %24 = math.log %23 : vector<8x1xf32>
    %25 = arith.addf %24, %18 : vector<8x1xf32>
    %26 = tpu.iota {dimensions = array<i32: 1>} : vector<8x128xi32>
    %27 = vector.broadcast %7 : vector<8x1xi32> to vector<8x128xi32>
    %28 = arith.cmpi eq, %26, %27 : vector<8x128xi32>
    %29 = arith.extui %28 : vector<8x128xi1> to vector<8x128xi32>
    %30 = arith.sitofp %29 : vector<8x128xi32> to vector<8x128xf32>
    %31 = arith.mulf %5, %30 : vector<8x128xf32>
    %cst_11 = arith.constant dense<0.000000e+00> : vector<8xf32>
    %32 = vector.multi_reduction <add>, %31, %cst_11 [1] : vector<8x128xf32> to vector<8xf32>
    %33 = vector.shape_cast %32 : vector<8xf32> to vector<8x1xf32>
    %34 = arith.subf %25, %33 : vector<8x1xf32>
    %cst_12 = arith.constant 0.000000e+00 : f32
    %35 = vector.broadcast %cst_12 : f32 to vector<8x1xf32>
    %36 = arith.select %16, %34, %35 : vector<8x1xi1>, vector<8x1xf32>
    %37 = vector.shape_cast %36 : vector<8x1xf32> to vector<1x8x1xf32>
    %cst_13 = arith.constant dense<0.000000e+00> : vector<1xf32>
    %38 = vector.multi_reduction <add>, %37, %cst_13 [1, 2] : vector<1x8x1xf32> to vector<1xf32>
    %39 = vector.shape_cast %38 : vector<1xf32> to vector<1x1x1xf32>
    %40 = vector.extract %39[0, 0, 0] : f32 from vector<1x1x1xf32>
    %41 = arith.extui %16 : vector<8x1xi1> to vector<8x1xi32>
    %42 = arith.sitofp %41 : vector<8x1xi32> to vector<8x1xf32>
    %43 = vector.shape_cast %42 : vector<8x1xf32> to vector<1x8x1xf32>
    %cst_14 = arith.constant dense<0.000000e+00> : vector<1xf32>
    %44 = vector.multi_reduction <add>, %43, %cst_14 [1, 2] : vector<1x8x1xf32> to vector<1xf32>
    %45 = vector.shape_cast %44 : vector<1xf32> to vector<1x1x1xf32>
    %46 = vector.extract %45[0, 0, 0] : f32 from vector<1x1x1xf32>
    %47 = tpu.iota {dimensions = array<i32: 2>} : vector<1x1x128xi32>
    %c0_i32 = arith.constant 0 : i32
    %48 = vector.broadcast %c0_i32 : i32 to vector<1x1x128xi32>
    %49 = arith.cmpi eq, %47, %48 : vector<1x1x128xi32>
    %c1_i32 = arith.constant 1 : i32
    %50 = vector.broadcast %c1_i32 : i32 to vector<1x1x128xi32>
    %51 = arith.cmpi eq, %47, %50 : vector<1x1x128xi32>
    %cst_15 = arith.constant 0.000000e+00 : f32
    %52 = vector.broadcast %46 : f32 to vector<1x1x128xf32>
    %53 = vector.broadcast %cst_15 : f32 to vector<1x1x128xf32>
    %54 = arith.select %51, %52, %53 : vector<1x1x128xi1>, vector<1x1x128xf32>
    %55 = vector.broadcast %40 : f32 to vector<1x1x128xf32>
    %56 = arith.select %49, %55, %54 : vector<1x1x128xi1>, vector<1x1x128xf32>
    %c0_16 = arith.constant 0 : index
    %c0_17 = arith.constant 0 : index
    %c0_18 = arith.constant 0 : index
    %57 = vector.load %arg6[%c0_16, %c0_17, %c0_18] : memref<1x1x128xf32, #tpu.memory_space<vmem>>, vector<1x1x128xf32>
    tpu.vector_store %arg6[%c0_16, %c0_17, %c0_18], %56 {strides = array<i32>} : memref<1x1x128xf32, #tpu.memory_space<vmem>>, vector<1x1x128xf32>,
    return
  }
  func.func @transform_0(%arg0: i32) -> (i32, i32) {
    %c0_i32 = arith.constant 0 : i32
    %c0_i32_0 = arith.constant 0 : i32
    return %arg0, %c0_i32 : i32, i32
  }
  func.func @transform_1(%arg0: i32) -> (i32, i32) {
    %c0_i32 = arith.constant 0 : i32
    %c0_i32_0 = arith.constant 0 : i32
    %c0_i32_1 = arith.constant 0 : i32
    return %c0_i32, %c0_i32_0 : i32, i32
  }
  func.func @transform_2(%arg0: i32) -> (i32, i32) {
    %c0_i32 = arith.constant 0 : i32
    %c0_i32_0 = arith.constant 0 : i32
    %c0_i32_1 = arith.constant 0 : i32
    return %c0_i32, %c0_i32_0 : i32, i32
  }
  func.func @transform_3(%arg0: i32) -> (i32, i32) {
    %c0_i32 = arith.constant 0 : i32
    %c0_i32_0 = arith.constant 0 : i32
    return %arg0, %c0_i32 : i32, i32
  }
  func.func @transform_4(%arg0: i32) -> (i32, i32) {
    %c0_i32 = arith.constant 0 : i32
    %c0_i32_0 = arith.constant 0 : i32
    return %arg0, %c0_i32 : i32, i32
  }
  func.func @transform_5(%arg0: i32) -> (i32, i32, i32) {
    %c0_i32 = arith.constant 0 : i32
    %c0_i32_0 = arith.constant 0 : i32
    %c0_i32_1 = arith.constant 0 : i32
    return %arg0, %c0_i32, %c0_i32_0 : i32, i32, i32
  }
}

</mosaic_0001>

<bundles_post_ra>
// kernel: slot_tagging_forward.1
= control target key start
LH: loop header
LB: loop body
LE: loop exit
PB: predicated region body
PF: predicated region fallthrough
CT: control target
= control target key end

     0   :  { %s620_s18 = smov 0   ;;  %s722_s0 = inlined_call_operand.vmem [shape: f32[16,128], index: 0, kind: input, shape index: {}]   ;;  %s723_s1 = inlined_call_operand.vmem [shape: f32[128,128], index: 1, kind: input, shape index: {}]   ;;  %s724_s2 = inlined_call_operand.vmem [shape: f32[1,128], index: 2, kind: input, shape index: {}]   ;;  %s725_s3 = inlined_call_operand.vmem [shape: s32[16,1], index: 3, kind: input, shape index: {}]   ;;  %s726_s4 = inlined_call_operand.vmem [shape: f32[16,128], index: 4, kind: output, shape index: {0}]   ;;  %s727_s5 = inlined_call_operand.vmem [shape: f32[2,1,128], index: 5, kind: output, shape index: {1}]  }
   0x1 LB: > { %s626_s19 = sadd.s32 4294967295, %s585_s18   ;;  %p497_p0 = scmp.ge.s32.totalorder %s585_s18, 1  ;;  %s585_s18 = sphi %s620_s18, %s16_s18  }
   0x2   : > { %p198_p1 = scmp.lt.s32.totalorder %s585_s18, 3 }
   0x4   : > { %p199_p2 = pnand %p497_p0, %p198_p1 }
   0x5   : > { %p231_p3 = scmp.lt.s32.totalorder (!%p199_p2), %s626_s19, 1  ;;  %s502_s20 = sshll.u32 (!%p199_p2), %s626_s19, 3 }
   0x6   : > { %202 = sbr.rel (%p199_p2) target bundleno = 763 (0x2fb), region = 36 }
   0xb   : > { %v262_v0 = vld [vmem:[%s723_s1 + $0x78] sm:$0xff]  ;;  %v587_v1 = vmov 0.0   ;;  %v261_v2 = vld [vmem:[%s723_s1 + $0x70] sm:$0xff]  ;;  %vm588_vm0 = vmmov 0   ;;  %v260_v3 = vld [vmem:[%s723_s1 + $0x68] sm:$0xff]  ;;  %s676_s17 = scalar_select %p231_p3, %s626_s19, 1  ;;  %v343_v27 = vlaneseq  ;;  %v345_v35 = vstv %s502_s20 }
   0xc   : > { %524 = vmatprep.subr.mxu0 %v587_v1  ;;  %556 = vmatprep.mubr.msk.f32.mxu0 %vm588_vm0, %v587_v1  ;;  %v259_v4 = vld [vmem:[%s723_s1 + $0x60] sm:$0xff]  ;;  %v258_v5 = vld [vmem:[%s723_s1 + $0x58] sm:$0xff]  ;;  %v257_v6 = vld [vmem:[%s723_s1 + $0x50] sm:$0xff]  ;;  %v589_v18 = vmov 0   ;;  %vm373_vm5 = vcmask 7168  }
   0xd   : > { %525 = vmatpush3.msra.mxu0 %v262_v0  ;;  %v256_v7 = vld [vmem:[%s723_s1 + $0x48] sm:$0xff]  ;;  %v255_v8 = vld [vmem:[%s723_s1 + $0x40] sm:$0xff]  ;;  %v254_v9 = vld [vmem:[%s723_s1 + $0x38] sm:$0xff]  ;;  %s498_s24 = sshll.u32 %s676_s17, 3  ;;  %574 = vset.pattern.permute.xlu0 %v589_v18  ;;  %v361_v28 = vand.u32 127, %v343_v27  ;;  %v344_v34 = vshrl.u32 %v343_v27, 7 }
   0xe   : > { %526 = vmatprep.subr.mxu0 %v587_v1  ;;  %v253_v10 = vld [vmem:[%s723_s1 + $0x30] sm:$0xff]  ;;  %v252_v11 = vld [vmem:[%s723_s1 + $0x28] sm:$0xff]  ;;  %v251_v12 = vld [vmem:[%s723_s1 + $0x20] sm:$0xff]  ;;  %s234_s6 = scalar_lea.vmem %s722_s0, %s498_s24  ;;  %s242_s13 = scalar_lea.vmem %s726_s4, %s498_s24 }
   0xf   : > { %527 = vmatpush3.msra.mxu0 %v261_v2  ;;  %v250_v13 = vld [vmem:[%s723_s1 + $0x18] sm:$0xff]  ;;  %v249_v14 = vld [vmem:[%s723_s1 + $0x10] sm:$0xff]  ;;  %v248_v15 = vld [vmem:[%s723_s1 + $0x8] sm:$0xff]  ;;  %s238_s16 = scalar_lea.vmem %s725_s3, %s498_s24  ;;  %v346_v36 = vadd.s32 %v345_v35, %v344_v34  ;;  %vm397_vm6 = vcmp.eq.s32.totalorder %v361_v28, 1  ;;  %vm396_vm7 = vcmp.eq.s32.totalorder %v361_v28, 0  ;;  %s245_s24 = scalar_lea.vmem %s727_s5, %s676_s17 }
  0x10   : > { %528 = vmatprep.subr.mxu0 %v587_v1  ;;  %v247_v16 = vld [vmem:[%s723_s1] sm:$0xff] }
  0x11   : > { %529 = vmatpush3.msra.mxu0 %v260_v3  ;;  %v246_v17 = vld [vmem:[%s234_s6] sm:$0xff]  ;;  %vm348_vm3 = vcmp.lt.s32.totalorder %v346_v36, 16 }
  0x12   : > { %530 = vmatprep.subr.mxu0 %v587_v1  ;;  %v501_v19 = vld [vmem:[%s724_s2] ss:$0 sm:$0xff] }
  0x13   : > { %531 = vmatpush3.msra.mxu0 %v259_v4  ;;  %v341_v23 = vld [vmem:[%s238_s16] sm:$0xff] }
  0x14   : > { %532 = vmatprep.subr.mxu0 %v587_v1  ;;  %vm347_vm2 = vcmp.ne.s32.totalorder %v341_v23, 4294967196 }
  0x15   : > { %533 = vmatpush3.msra.mxu0 %v258_v5  ;;  %vm349_vm4 = vmand %vm347_vm2, %vm348_vm3 }
  0x16   : > { %534 = vmatprep.subr.mxu0 %v587_v1  ;;  %v504_v43 = vsel %vm349_vm4, 1.0, %v587_v1 }
  0x17   : > { %535 = vmatpush3.msra.mxu0 %v257_v6  ;;  %v386_v45 = vsel %vm373_vm5, %v504_v43, 0.0 }
  0x18   : > { %536 = vmatprep.subr.mxu0 %v587_v1 }
  0x19   : > { %537 = vmatpush3.msra.mxu0 %v256_v7 }
  0x1a   : > { %538 = vmatprep.subr.mxu0 %v587_v1 }
  0x1b   : > { %539 = vmatpush3.msra.mxu0 %v255_v8 }
  0x1c   : > { %540 = vmatprep.subr.mxu0 %v587_v1 }
  0x1d   : > { %541 = vmatpush3.msra.mxu0 %v254_v9 }
  0x1e   : > { %542 = vmatprep.subr.mxu0 %v587_v1 }
  0x1f   : > { %543 = vmatpush3.msra.mxu0 %v253_v10 }
  0x20   : > { %544 = vmatprep.subr.mxu0 %v587_v1 }
  0x21   : > { %545 = vmatpush3.msra.mxu0 %v252_v11 }
  0x22   : > { %546 = vmatprep.subr.mxu0 %v587_v1 }
  0x23   : > { %547 = vmatpush3.msra.mxu0 %v251_v12 }
  0x24   : > { %548 = vmatprep.subr.mxu0 %v587_v1 }
  0x25   : > { %549 = vmatpush3.msra.mxu0 %v250_v13 }
  0x26   : > { %550 = vmatprep.subr.mxu0 %v587_v1 }
  0x27   : > { %551 = vmatpush3.msra.mxu0 %v249_v14 }
  0x28   : > { %552 = vmatprep.subr.mxu0 %v587_v1 }
  0x29   : > { %553 = vmatpush3.msra.mxu0 %v248_v15 }
  0x2a   : > { %554 = vmatprep.subr.mxu0 %v587_v1 }
  0x2b   : > { %555 = vmatpush3.msra.mxu0 %v247_v16 }
  0x2c   : > { %557 = vmatmul.mubr.f32.vlgmr.msra.gmra.mxu0 %v246_v17 }
  0xec   : > { %v336_v20 = vpop.f32.mrf.mxu0 }
  0xed   : > { %v337_v21 = vadd.f32 %v501_v19, %v336_v20 }
  0xee   : > { %v558_v22 = vpop.f32.mrf.mxu0 }
  0xef   : > { %340 = vst [vmem:[%s242_s13] sm:$0xff] %v337_v21  ;;  %350 = vmax.xlane.f32.xlu0 %v337_v21 }
 0x105   : > { %363 = vperm.xlu0 %574, %v341_v23  }
 0x178   : > { %v351_v24 = vpop.xlane.xlu0 %350 }
 0x179   : > { %v352_v25 = vsub.f32 %v337_v21, %v351_v24 }
 0x17b   : > { %v353_v26 = vmul.f32 1.442695, %v352_v25 }
 0x17d   : > { %575 = vpow2.f32 %v353_v26 }
 0x180   : > { %v364_v29 = vpop.permute.xlu0 %363 }
 0x181   : > { %vm365_vm1 = vcmp.eq.s32.totalorder %v361_v28, %v364_v29 }
 0x182   : > { %v503_v31 = vsel %vm365_vm1, 1.0, %v587_v1 }
 0x183   : > { %v368_v32 = vmul.f32 %v503_v31, %v337_v21 }
 0x18a   : > { %v576_v30 = vpop.eup %575 }
 0x18b   : > { %355 = vadd.xlane.f32.xlu1 %v576_v30 }
 0x18f   : > { %369 = vadd.xlane.f32.xlu1 %v368_v32 }
 0x214   : > { %v356_v33 = vpop.xlane.xlu1 %355 }
 0x215   : > { %577 = vlog2.f32 %v356_v33 }
 0x218   : > { %v370_v40 = vpop.xlane.xlu1 %369 }
 0x222   : > { %v578_v37 = vpop.eup %577 }
 0x223   : > { %v358_v38 = vmul.f32 0.6931472, %v578_v37 }
 0x225   : > { %v359_v39 = vadd.f32 %v358_v38, %v351_v24 }
 0x227   : > { %v371_v41 = vsub.f32 %v359_v39, %v370_v40 }
 0x229   : > { %v372_v42 = vsel %vm349_vm4, %v371_v41, 0.0 }
 0x22a   : > { %v374_v44 = vsel %vm373_vm5, %v372_v42, 0.0 }
 0x22b   : > { %375 = vadd.xlane.f32.xlu1 %v374_v44 }
 0x22f   : > { %387 = vadd.xlane.f32.xlu1 %v386_v45 }
 0x2b4   : > { %v376_v46 = vpop.xlane.xlu1 %375 }
 0x2b5   : > { %v377_v47 = vrot.slane %v376_v46, 4 }
 0x2b7   : > { %v378_v48 = vadd.f32 %v377_v47, %v376_v46 }
 0x2b8   : > { %v388_v49 = vpop.xlane.xlu1 %387 }
 0x2b9   : > { %v379_v50 = vrot.slane %v378_v48, 2  ;;  %v389_v51 = vrot.slane %v388_v49, 4 }
 0x2bb   : > { %v390_v52 = vadd.f32 %v389_v51, %v388_v49  ;;  %v380_v53 = vadd.f32 %v379_v50, %v378_v48 }
 0x2bd   : > { %v391_v54 = vrot.slane %v390_v52, 2  ;;  %v381_v55 = vrot.slane %v380_v53, 1 }
 0x2bf   : > { %v392_v56 = vadd.f32 %v391_v54, %v390_v52  ;;  %v382_v57 = vadd.f32 %v381_v55, %v380_v53 }
 0x2c1   : > { %559 = vpush %v382_v57  ;;  %v393_v58 = vrot.slane %v392_v56, 1 }
 0x2c3   : > { %v394_v59 = vadd.f32 %v393_v58, %v392_v56 }
 0x2c5   : > { %561 = vpush %v394_v59 }
 0x2f2   : > { %s560_s19 = spop %559 }
 0x2f3   : > { %v400_v61 = vstv %s560_s19 }
 0x2f6   : > { %s562_s21 = spop %561 }
 0x2f7   : > { %v398_v60 = vstv %s562_s21 }
 0x2f8   : > { %v399_v62 = vsel %vm397_vm6, %v398_v60, 0.0 }
 0x2f9   : > { %v401_v63 = vsel %vm396_vm7, %v400_v61, %v399_v62 }
 0x2fa   : > { %402 = vst [vmem:[%s245_s24] sm:$0x1] %v401_v63 }
 0x2fb PF: > { %s16_s18 = sadd.s32 1, %s585_s18  }
 0x2fc   : > { %p13_p4 = scmp.ge.s32.totalorder %s16_s18, 4  }
 0x2fe   :  { %15 = sbr.rel (!%p13_p4) target bundleno = 1 (0x1), region = 81 }

</bundles_post_ra>
